<compile_context>
chip_gen: v5e
topology: v5e:2x2
jax: 0.10.0
libtpu: 0.0.40
codegen_flags: <defaults>
</compile_context>

<pallas_src>
import functools

import jax
import jax.numpy as jnp
from jax.experimental import pallas as pl
from jax.experimental.pallas import tpu as pltpu


def _round_up(x, m):
    return ((x + m - 1) // m) * m


def _cdiv(a, b):
    return -(-a // b)


def _vmem_capacity_bytes():
    """Per-core VMEM capacity; conservative fallback if the query fails."""
    try:
        cap = int(getattr(pltpu.get_tpu_info(), "vmem_capacity_bytes", 0))
        if cap > 0:
            return cap
    except Exception:  # off-TPU tracing / older runtimes
        pass
    return 64 << 20  # v7x per-core size; fallback only makes tiles smaller


def _choose_tiling(N, C, HW, itemsize):
    """Pick (BN batch rows per block, T lanes per tile, vmem_limit_bytes)."""
    sublane = {1: 32, 2: 16, 4: 8}.get(itemsize, 8)
    c_pad = _round_up(C, sublane)
    hw128 = _round_up(HW, 128)

    cap = _vmem_capacity_bytes()
    budget = max(int(cap * 0.6), 16 << 20)  # VMEM for input buffers + temps

    # VMEM bytes per (batch row x lane):
    #   2 inputs x 2 pipeline buffers x sublane-padded channels (input dtype)
    #   + ~6 live f32 (BN,1,T)-shaped temporaries (channel-loop path)
    #     or 3 full-block f32 copies (C > 32 vectorized path).
    temp = 6 * 4 if C <= 32 else (3 * c_pad + 3) * 4
    per_lane = 2 * 2 * c_pad * itemsize + temp
    max_bt = max(budget // per_lane, 128)  # max BN * T

    if hw128 <= max_bt:
        T = hw128
        bn = min(N, max(1, max_bt // hw128))
        while N % bn:          # keep BN a divisor of N (no batch-ragged blocks)
            bn -= 1
    else:
        bn = 1
        T = (max_bt // 128) * 128

    # v7x has 2 TensorCores: give a non-trivial problem >= 2 parallel grid
    # steps so both cores get work (harmless extra step on 1-TC v5e/v6e).
    total_bytes = 2 * N * C * HW * itemsize
    if (N // bn) * _cdiv(HW, T) < 2 and total_bytes >= (2 << 20):
        if N >= 2:
            bn = N // 2
            while N % bn:
                bn -= 1
        elif hw128 >= 256:
            T = _round_up(_cdiv(hw128, 2), 128)

    vmem_limit = min(int(cap * 0.9), budget + (16 << 20))
    return bn, T, vmem_limit


def _l1_partial_kernel(eps, hw, pred_ref, target_ref, loss_ref, mask_ref):
    """One (batch-block i, HW-tile j) grid step.

    pred_ref/target_ref : (BN, C, T) input blocks (HBM dtype, cast in-kernel).
    loss_ref/mask_ref   : (1, 1, 8, 128) f32 per-step partial-sum blocks
                          (scalar broadcast; the wrapper reads [..., 0, 0]).
    """
    j = pl.program_id(1)
    bn, nc, t = pred_ref.shape

    # Lanes of this tile that fall inside the real (unpadded) HW extent.
    col = j * t + jax.lax.broadcasted_iota(jnp.int32, (bn, 1, t), 2)
    lane_valid = col < hw

    tgt0 = target_ref[:, 0:1, :].astype(jnp.float32)
    ch_mask = (tgt0 > eps).astype(jnp.float32)             # (BN, 1, T)

    if nc <= 32:
        # Unrolled channel loop keeps f32 temporaries (BN, 1, T)-sized.
        diff = jnp.zeros((bn, 1, t), jnp.float32)
        for c in range(nc):
            p = pred_ref[:, c:c + 1, :].astype(jnp.float32)
            g = target_ref[:, c:c + 1, :].astype(jnp.float32)
            diff = diff + jnp.abs(p - g)
    else:
        diff = jnp.sum(
            jnp.abs(pred_ref[...].astype(jnp.float32)
                    - target_ref[...].astype(jnp.float32)),
            axis=1, keepdims=True)

    # diff * ch_mask matches torch (NaN in valid lanes propagates and is caught
    # by the final nan_to_num).  Ragged-tail lanes hold unspecified data, so
    # hard-zero them with where() (a multiply could leak NaN/Inf).
    masked = jnp.where(lane_valid, diff * ch_mask, 0.0)
    valid = jnp.where(lane_valid, ch_mask, 0.0)

    loss_ref[...] = jnp.full(loss_ref.shape, jnp.sum(masked), dtype=jnp.float32)
    mask_ref[...] = jnp.full(mask_ref.shape, jnp.sum(valid), dtype=jnp.float32)


def l1_loss_forward(pred, target, *, reduction="mean", loss_weight=1.0, eps=-100.0):
    """Pallas implementation of mmseg L1Loss.forward
    (valid_mask / weight / avg_factor / reduction_override = None)."""
    assert pred.shape == target.shape, "pred/target shape mismatch"
    assert reduction in ("mean", "sum"), "only 'mean'/'sum' supported here"
    # TODO(synk): reduction='none' (elementwise output) not wired up; the
    # zero-valid-mask early return changes the output rank in that case, which
    # a fixed out_shape cannot express.

    N, C, H, W = pred.shape
    HW = H * W
    pred3 = pred.reshape(N, C, HW)
    target3 = target.reshape(N, C, HW)

    itemsize = jnp.dtype(pred.dtype).itemsize
    bn, T, vmem_limit = _choose_tiling(N, C, HW, itemsize)
    n_blk = N // bn
    J = _cdiv(HW, T)

    kernel = functools.partial(_l1_partial_kernel, float(eps), HW)

    loss_part, mask_part = pl.pallas_call(
        kernel,
        out_shape=(
            jax.ShapeDtypeStruct((n_blk, J, 8, 128), jnp.float32),
            jax.ShapeDtypeStruct((n_blk, J, 8, 128), jnp.float32),
        ),
        grid_spec=pltpu.PrefetchScalarGridSpec(
            num_scalar_prefetch=0,
            grid=(n_blk, J),
            in_specs=[
                pl.BlockSpec((bn, C, T), lambda i, j: (i, 0, j)),
                pl.BlockSpec((bn, C, T), lambda i, j: (i, 0, j)),
            ],
            out_specs=[
                pl.BlockSpec((1, 1, 8, 128), lambda i, j: (i, j, 0, 0)),
                pl.BlockSpec((1, 1, 8, 128), lambda i, j: (i, j, 0, 0)),
            ],
        ),
        compiler_params=pltpu.CompilerParams(
            dimension_semantics=("parallel", "parallel"),
            vmem_limit_bytes=int(vmem_limit),
        ),
    )(pred3, target3)

    # Tiny final reduction (a few KiB) done by XLA, in f32.
    loss_sum = jnp.sum(loss_part[:, :, 0, 0], dtype=jnp.float32)
    mask_sum = jnp.sum(mask_part[:, :, 0, 0], dtype=jnp.float32)

    if reduction == "mean":
        reduced = loss_sum / jnp.maximum(mask_sum, 1.0)
    else:  # sum
        reduced = loss_sum

    # valid_mask.sum() == 0 -> 0.0 * pred.sum() (== 0.0 for finite preds; the
    # NaN-propagating corner case of the original is intentionally a hard 0).
    loss = jnp.where(mask_sum == 0.0, jnp.float32(0.0), reduced)
    loss = loss * jnp.float32(loss_weight)
    loss = jnp.nan_to_num(loss, nan=0.0, posinf=0.0, neginf=0.0)
    return loss.astype(pred.dtype)


def _ref_l1_loss(pred, target, eps=-100.0, loss_weight=1.0):
    p = pred.astype(jnp.float32)
    t = target.astype(jnp.float32)
    mask = (t[:, 0:1, :, :] > eps).astype(jnp.float32)
    num = jnp.sum(jnp.abs(p - t) * mask)
    return num / jnp.maximum(jnp.sum(mask), 1.0) * loss_weight


if __name__ == "__main__":
    key = jax.random.PRNGKey(0)
    ks = jax.random.split(key, 8)

    # 1) Small, module-consistent shape (single-step grid).
    pred = jax.random.normal(ks[0], (2, 4, 16, 16), dtype=jnp.float32)
    target = jax.random.normal(ks[1], (2, 4, 16, 16), dtype=jnp.float32)
    out = jax.block_until_ready(l1_loss_forward(pred, target))
    ref = _ref_l1_loss(pred, target)
    assert jnp.allclose(out, ref, rtol=1e-5, atol=1e-6), (out, ref)

    # 2) HW not a multiple of 128 (exercises in-kernel ragged-tail masking)
    #    plus an eps-masked-out region.
    pred = jax.random.normal(ks[2], (1, 3, 33, 35), dtype=jnp.float32)
    target = jax.random.normal(ks[3], (1, 3, 33, 35), dtype=jnp.float32)
    target = target.at[:, :, :5, :].set(-200.0)
    out = jax.block_until_ready(l1_loss_forward(pred, target))
    ref = _ref_l1_loss(pred, target)
    assert jnp.allclose(out, ref, rtol=1e-5, atol=1e-6), (out, ref)

    # 3) Larger f32 problem: exercises the multi-step tiled grid.
    pred = jax.random.normal(ks[4], (2, 4, 512, 512), dtype=jnp.float32)
    target = jax.random.normal(ks[5], (2, 4, 512, 512), dtype=jnp.float32)
    out = jax.block_until_ready(l1_loss_forward(pred, target))
    ref = _ref_l1_loss(pred, target)
    assert jnp.allclose(out, ref, rtol=1e-4, atol=1e-5), (out, ref)

    # 4) bf16 inputs (itemsize-aware tiling; f32 accumulation in-kernel).
    pred = jax.random.normal(ks[6], (2, 4, 96, 96)).astype(jnp.bfloat16)
    target = jax.random.normal(ks[7], (2, 4, 96, 96)).astype(jnp.bfloat16)
    out = jax.block_until_ready(l1_loss_forward(pred, target))
    ref = _ref_l1_loss(pred, target)
    assert jnp.allclose(out.astype(jnp.float32), ref, rtol=2e-2, atol=2e-2), (out, ref)

    # 5) All-invalid target -> loss must be exactly 0.
    pred = jax.random.normal(ks[0], (1, 2, 8, 8), dtype=jnp.float32)
    target = jnp.full((1, 2, 8, 8), -200.0, dtype=jnp.float32)
    out = jax.block_until_ready(l1_loss_forward(pred, target))
    assert out == 0.0, out

    print("KERNEL_OK")
</pallas_src>

<mosaic_0001>
module attributes {stable_mosaic.version = 11 : i64} {
  func.func @_l1_partial_kernel(%arg0: i32, %arg1: i32, %arg2: memref<2x4x256xf32, #tpu.memory_space<vmem>>, %arg3: memref<2x4x256xf32, #tpu.memory_space<vmem>>, %arg4: memref<1x1x8x128xf32, #tpu.memory_space<vmem>>, %arg5: memref<1x1x8x128xf32, #tpu.memory_space<vmem>>) attributes {dimension_semantics = [#tpu.dimension_semantics<parallel>, #tpu.dimension_semantics<parallel>], iteration_bounds = array<i64: 1, 1>, scalar_prefetch = 0 : i64, scratch_operands = 0 : i64, tpu.core_type = #tpu.core_type<tc>, window_params = [{transform_indices = @transform_0, window_bounds = array<i64: 2, 4, 256>}, {transform_indices = @transform_1, window_bounds = array<i64: 2, 4, 256>}, {transform_indices = @transform_2, window_bounds = array<i64: 1, 1, 8, 128>}, {transform_indices = @transform_3, window_bounds = array<i64: 1, 1, 8, 128>}]} {
    %c256_i32 = arith.constant 256 : i32
    %0 = arith.muli %arg1, %c256_i32 : i32
    %1 = tpu.iota {dimensions = array<i32: 2>} : vector<2x1x256xi32>
    %2 = vector.broadcast %0 : i32 to vector<2x1x256xi32>
    %3 = arith.addi %2, %1 : vector<2x1x256xi32>
    %c256_i32_0 = arith.constant 256 : i32
    %4 = vector.broadcast %c256_i32_0 : i32 to vector<2x1x256xi32>
    %5 = arith.cmpi slt, %3, %4 : vector<2x1x256xi32>
    %c0 = arith.constant 0 : index
    %c0_1 = arith.constant 0 : index
    %c0_2 = arith.constant 0 : index
    %6 = vector.load %arg3[%c0, %c0_1, %c0_2] : memref<2x4x256xf32, #tpu.memory_space<vmem>>, vector<2x1x256xf32>
    %cst = arith.constant -1.000000e+02 : f32
    %7 = vector.broadcast %cst : f32 to vector<2x1x256xf32>
    %8 = arith.cmpf ogt, %6, %7 : vector<2x1x256xf32>
    %9 = arith.extui %8 : vector<2x1x256xi1> to vector<2x1x256xi32>
    %10 = arith.sitofp %9 : vector<2x1x256xi32> to vector<2x1x256xf32>
    %cst_3 = arith.constant 0.000000e+00 : f32
    %11 = vector.broadcast %cst_3 : f32 to vector<2x1x256xf32>
    %c0_4 = arith.constant 0 : index
    %c0_5 = arith.constant 0 : index
    %c0_6 = arith.constant 0 : index
    %12 = vector.load %arg2[%c0_4, %c0_5, %c0_6] : memref<2x4x256xf32, #tpu.memory_space<vmem>>, vector<2x1x256xf32>
    %c0_7 = arith.constant 0 : index
    %c0_8 = arith.constant 0 : index
    %c0_9 = arith.constant 0 : index
    %13 = vector.load %arg3[%c0_7, %c0_8, %c0_9] : memref<2x4x256xf32, #tpu.memory_space<vmem>>, vector<2x1x256xf32>
    %14 = arith.subf %12, %13 : vector<2x1x256xf32>
    %15 = math.absf %14 : vector<2x1x256xf32>
    %16 = arith.addf %11, %15 : vector<2x1x256xf32>
    %c0_10 = arith.constant 0 : index
    %c1 = arith.constant 1 : index
    %c0_11 = arith.constant 0 : index
    %17 = vector.load %arg2[%c0_10, %c1, %c0_11] : memref<2x4x256xf32, #tpu.memory_space<vmem>>, vector<2x1x256xf32>
    %c0_12 = arith.constant 0 : index
    %c1_13 = arith.constant 1 : index
    %c0_14 = arith.constant 0 : index
    %18 = vector.load %arg3[%c0_12, %c1_13, %c0_14] : memref<2x4x256xf32, #tpu.memory_space<vmem>>, vector<2x1x256xf32>
    %19 = arith.subf %17, %18 : vector<2x1x256xf32>
    %20 = math.absf %19 : vector<2x1x256xf32>
    %21 = arith.addf %16, %20 : vector<2x1x256xf32>
    %c0_15 = arith.constant 0 : index
    %c2 = arith.constant 2 : index
    %c0_16 = arith.constant 0 : index
    %22 = vector.load %arg2[%c0_15, %c2, %c0_16] : memref<2x4x256xf32, #tpu.memory_space<vmem>>, vector<2x1x256xf32>
    %c0_17 = arith.constant 0 : index
    %c2_18 = arith.constant 2 : index
    %c0_19 = arith.constant 0 : index
    %23 = vector.load %arg3[%c0_17, %c2_18, %c0_19] : memref<2x4x256xf32, #tpu.memory_space<vmem>>, vector<2x1x256xf32>
    %24 = arith.subf %22, %23 : vector<2x1x256xf32>
    %25 = math.absf %24 : vector<2x1x256xf32>
    %26 = arith.addf %21, %25 : vector<2x1x256xf32>
    %c0_20 = arith.constant 0 : index
    %c3 = arith.constant 3 : index
    %c0_21 = arith.constant 0 : index
    %27 = vector.load %arg2[%c0_20, %c3, %c0_21] : memref<2x4x256xf32, #tpu.memory_space<vmem>>, vector<2x1x256xf32>
    %c0_22 = arith.constant 0 : index
    %c3_23 = arith.constant 3 : index
    %c0_24 = arith.constant 0 : index
    %28 = vector.load %arg3[%c0_22, %c3_23, %c0_24] : memref<2x4x256xf32, #tpu.memory_space<vmem>>, vector<2x1x256xf32>
    %29 = arith.subf %27, %28 : vector<2x1x256xf32>
    %30 = math.absf %29 : vector<2x1x256xf32>
    %31 = arith.addf %26, %30 : vector<2x1x256xf32>
    %32 = arith.mulf %31, %10 : vector<2x1x256xf32>
    %cst_25 = arith.constant 0.000000e+00 : f32
    %33 = vector.broadcast %cst_25 : f32 to vector<2x1x256xf32>
    %34 = arith.select %5, %32, %33 : vector<2x1x256xi1>, vector<2x1x256xf32>
    %cst_26 = arith.constant 0.000000e+00 : f32
    %35 = vector.broadcast %cst_26 : f32 to vector<2x1x256xf32>
    %36 = arith.select %5, %10, %35 : vector<2x1x256xi1>, vector<2x1x256xf32>
    %37 = vector.shape_cast %34 : vector<2x1x256xf32> to vector<1x2x1x256xf32>
    %cst_27 = arith.constant dense<0.000000e+00> : vector<1xf32>
    %38 = vector.multi_reduction <add>, %37, %cst_27 [1, 2, 3] : vector<1x2x1x256xf32> to vector<1xf32>
    %39 = vector.shape_cast %38 : vector<1xf32> to vector<1x1x1x1xf32>
    %40 = vector.extract %39[0, 0, 0, 0] : f32 from vector<1x1x1x1xf32>
    %41 = vector.broadcast %40 : f32 to vector<1x1x8x128xf32>
    %c0_28 = arith.constant 0 : index
    %c0_29 = arith.constant 0 : index
    %c0_30 = arith.constant 0 : index
    %c0_31 = arith.constant 0 : index
    %42 = vector.load %arg4[%c0_28, %c0_29, %c0_30, %c0_31] : memref<1x1x8x128xf32, #tpu.memory_space<vmem>>, vector<1x1x8x128xf32>
    tpu.vector_store %arg4[%c0_28, %c0_29, %c0_30, %c0_31], %41 {strides = array<i32>} : memref<1x1x8x128xf32, #tpu.memory_space<vmem>>, vector<1x1x8x128xf32>,
    %43 = vector.shape_cast %36 : vector<2x1x256xf32> to vector<1x2x1x256xf32>
    %cst_32 = arith.constant dense<0.000000e+00> : vector<1xf32>
    %44 = vector.multi_reduction <add>, %43, %cst_32 [1, 2, 3] : vector<1x2x1x256xf32> to vector<1xf32>
    %45 = vector.shape_cast %44 : vector<1xf32> to vector<1x1x1x1xf32>
    %46 = vector.extract %45[0, 0, 0, 0] : f32 from vector<1x1x1x1xf32>
    %47 = vector.broadcast %46 : f32 to vector<1x1x8x128xf32>
    %c0_33 = arith.constant 0 : index
    %c0_34 = arith.constant 0 : index
    %c0_35 = arith.constant 0 : index
    %c0_36 = arith.constant 0 : index
    %48 = vector.load %arg5[%c0_33, %c0_34, %c0_35, %c0_36] : memref<1x1x8x128xf32, #tpu.memory_space<vmem>>, vector<1x1x8x128xf32>
    tpu.vector_store %arg5[%c0_33, %c0_34, %c0_35, %c0_36], %47 {strides = array<i32>} : memref<1x1x8x128xf32, #tpu.memory_space<vmem>>, vector<1x1x8x128xf32>,
    return
  }
  func.func @transform_0(%arg0: i32, %arg1: i32) -> (i32, i32, i32) {
    %c0_i32 = arith.constant 0 : i32
    %c0_i32_0 = arith.constant 0 : i32
    return %arg0, %c0_i32, %arg1 : i32, i32, i32
  }
  func.func @transform_1(%arg0: i32, %arg1: i32) -> (i32, i32, i32) {
    %c0_i32 = arith.constant 0 : i32
    %c0_i32_0 = arith.constant 0 : i32
    return %arg0, %c0_i32, %arg1 : i32, i32, i32
  }
  func.func @transform_2(%arg0: i32, %arg1: i32) -> (i32, i32, i32, i32) {
    %c0_i32 = arith.constant 0 : i32
    %c0_i32_0 = arith.constant 0 : i32
    %c0_i32_1 = arith.constant 0 : i32
    return %arg0, %arg1, %c0_i32, %c0_i32_0 : i32, i32, i32, i32
  }
  func.func @transform_3(%arg0: i32, %arg1: i32) -> (i32, i32, i32, i32) {
    %c0_i32 = arith.constant 0 : i32
    %c0_i32_0 = arith.constant 0 : i32
    %c0_i32_1 = arith.constant 0 : i32
    return %arg0, %arg1, %c0_i32, %c0_i32_0 : i32, i32, i32, i32
  }
}

</mosaic_0001>

<bundles_post_ra>
// kernel: tpu_custom_call.1
= control target key start
LH: loop header
LB: loop body
LE: loop exit
PB: predicated region body
PF: predicated region fallthrough
CT: control target
= control target key end

     0   :  { %9 = vsyncpa [#allocation3], 0  ;;  %s381_s0 = inlined_call_operand.hbm [shape: f32[2,4,256], index: 0, kind: input, shape index: {}]   ;;  %s382_s1 = inlined_call_operand.hbm [shape: f32[2,4,256], index: 1, kind: input, shape index: {}]   ;;  %s383_s2 = inlined_call_operand.hbm [shape: f32[1,1,8,128], index: 2, kind: output, shape index: {0}]   ;;  %s384_s3 = inlined_call_operand.hbm [shape: f32[1,1,8,128], index: 3, kind: output, shape index: {1}]  }
   0x1   :  { %10 = vsyncpa [#allocation6], 0 }
   0x2   :  { %11 = vsyncpa [#allocation4], 0 }
   0x3   :  { %12 = vsyncpa [#allocation9], 0  ;;  %s17_s14 = sshll.u32 %s381_s0, 4  ;;  %s334_s15 = smov [#allocation2]   ;;  %s18_s14 = int_to_ptr.hbm [resolvable:$true] %s17_s14 }
   0x4   :  { %s19_s16 = sshll.u32 %s334_s15, 4  ;;  %s30_s19 = sshll.u32 %s382_s1, 4  ;;  %s20_s16 = int_to_ptr.vmem [resolvable:$true] %s19_s16  ;;  %s31_s19 = int_to_ptr.hbm [resolvable:$true] %s30_s19 }
   0x5   :  { %s335_s20 = smov 128   ;;  %s336_s21 = smov 8  }
   0x6   :  { %25 = dma.hbm_to_vmem [thread:$0]  %s18_s14, 256, %s20_s16, [#allocation3], %s335_s20, %s335_s20, %s336_s21  }
   0x7   :  { %s337_s22 = smov [#allocation5]  }
   0x8   :  { %s32_s23 = sshll.u32 %s337_s22, 4  ;;  %s33_s23 = int_to_ptr.vmem [resolvable:$true] %s32_s23 }
   0x9   :  { %38 = dma.hbm_to_vmem [thread:$0]  %s31_s19, 256, %s33_s23, [#allocation6], %s335_s20, %s335_s20, %s336_s21  }
   0xa   :  { %326 = dma.done.wait [#allocation3], 256  }
   0xb   :  { %327 = vsyncadd [#allocation3], 4294967040 }
   0xc   :  { %328 = dma.done.wait [#allocation6], 256  }
   0xd   :  { %329 = vsyncadd [#allocation6], 4294967040  ;;  %v56_v0 = vld [vmem:[#allocation5] ss:$4 sm:$0x3]  ;;  %v338_v35 = vmov 0.0  }
   0xe   :  { %v58_v1 = vld [vmem:[#allocation5 + $0x8] ss:$4 sm:$0x3]  ;;  %v65_v2 = vld [vmem:[#allocation2] ss:$4 sm:$0x3] }
   0xf   :  { %v67_v3 = vld [vmem:[#allocation2 + $0x8] ss:$4 sm:$0x3]  ;;  %v68_v4 = vsub.f32 %v65_v2, %v56_v0  ;;  %v75_v6 = vld [vmem:[#allocation2 + $0x1] ss:$4 sm:$0x3] }
  0x10   :  { %v69_v5 = vsub.f32 %v67_v3, %v58_v1  ;;  %v77_v7 = vld [vmem:[#allocation2 + $0x9] ss:$4 sm:$0x3]  ;;  %v79_v9 = vld [vmem:[#allocation5 + $0x1] ss:$4 sm:$0x3] }
  0x11   :  { %v70_v8 = vand.u32 2147483647, %v68_v4  ;;  %v81_v11 = vld [vmem:[#allocation5 + $0x9] ss:$4 sm:$0x3]  ;;  %v82_v12 = vsub.f32 %v75_v6, %v79_v9  ;;  %vm59_vm0 = vcmp.gt.f32.partialorder %v56_v0, -100.0 }
  0x12   :  { %v71_v10 = vand.u32 2147483647, %v69_v5  ;;  %v83_v13 = vsub.f32 %v77_v7, %v81_v11  ;;  %v89_v14 = vld [vmem:[#allocation2 + $0x2] ss:$4 sm:$0x3]  ;;  %vm60_vm1 = vcmp.gt.f32.partialorder %v58_v1, -100.0 }
  0x13   :  { %v91_v15 = vld [vmem:[#allocation2 + $0xa] ss:$4 sm:$0x3]  ;;  %v84_v16 = vand.u32 2147483647, %v82_v12  ;;  %v217_v36 = vsel %vm59_vm0, 1.0, %v338_v35 }
  0x14   :  { %v93_v17 = vld [vmem:[#allocation5 + $0x2] ss:$4 sm:$0x3]  ;;  %v85_v18 = vand.u32 2147483647, %v83_v13  ;;  %v218_v38 = vsel %vm60_vm1, 1.0, %v338_v35 }
  0x15   :  { %v95_v19 = vld [vmem:[#allocation5 + $0xa] ss:$4 sm:$0x3]  ;;  %v96_v20 = vsub.f32 %v89_v14, %v93_v17  ;;  %v86_v21 = vadd.f32 %v84_v16, %v70_v8  ;;  %v103_v23 = vld [vmem:[#allocation2 + $0x3] ss:$4 sm:$0x3] }
  0x16   :  { %v97_v22 = vsub.f32 %v91_v15, %v95_v19  ;;  %v105_v24 = vld [vmem:[#allocation2 + $0xb] ss:$4 sm:$0x3]  ;;  %v87_v25 = vadd.f32 %v85_v18, %v71_v10  ;;  %v107_v27 = vld [vmem:[#allocation5 + $0x3] ss:$4 sm:$0x3] }
  0x17   :  { %v98_v26 = vand.u32 2147483647, %v96_v20  ;;  %v109_v29 = vld [vmem:[#allocation5 + $0xb] ss:$4 sm:$0x3]  ;;  %v110_v30 = vsub.f32 %v103_v23, %v107_v27  ;;  %v134_v42 = vperm.slane %v217_v36, 0 }
  0x18   :  { %v99_v28 = vand.u32 2147483647, %v97_v22  ;;  %v111_v32 = vsub.f32 %v105_v24, %v109_v29  ;;  %v135_v43 = vperm.slane %v217_v36, 1  ;;  %vm146_vm2 = vcmask 1040384   ;;  %s339_s0 = smov [#allocation7]   ;;  %s190_s26 = sshll.u32 %s383_s2, 4  ;;  %s191_s26 = int_to_ptr.hbm [resolvable:$true] %s190_s26 }
  0x19   :  { %v100_v31 = vadd.f32 %v98_v26, %v86_v21  ;;  %v112_v34 = vand.u32 2147483647, %v110_v30  ;;  %v136_v49 = vperm.slane %v218_v38, 0  ;;  %v165_v52 = vsel %vm146_vm2, %v134_v42, 0.0  ;;  %s188_s1 = sshll.u32 %s339_s0, 4  ;;  %s340_s28 = smov [#allocation8]   ;;  %s189_s1 = int_to_ptr.vmem [resolvable:$true] %s188_s1 }
  0x1a   :  { %v101_v33 = vadd.f32 %v99_v28, %v87_v25  ;;  %v113_v37 = vand.u32 2147483647, %v111_v32  ;;  %v166_v53 = vsel %vm146_vm2, %v135_v43, 0.0  ;;  %v137_v59 = vperm.slane %v218_v38, 1  ;;  %s199_s29 = sshll.u32 %s340_s28, 4  ;;  %s201_s5 = sshll.u32 %s384_s3, 4  ;;  %s200_s29 = int_to_ptr.vmem [resolvable:$true] %s199_s29  ;;  %s202_s5 = int_to_ptr.hbm [resolvable:$true] %s201_s5 }
  0x1b   :  { %v114_v39 = vadd.f32 %v112_v34, %v100_v31  ;;  %v167_v58 = vadd.f32 %v166_v53, %v165_v52  ;;  %v168_v60 = vsel %vm146_vm2, %v136_v49, 0.0 }
  0x1c   :  { %v115_v40 = vadd.f32 %v113_v37, %v101_v33  ;;  %v170_v63 = vsel %vm146_vm2, %v137_v59, 0.0 }
  0x1d   :  { %v116_v41 = vmul.f32 %v217_v36, %v114_v39  ;;  %v169_v62 = vadd.f32 %v168_v60, %v167_v58 }
  0x1e   :  { %v117_v44 = vmul.f32 %v218_v38, %v115_v40 }
  0x1f   :  { %v120_v45 = vperm.slane %v116_v41, 0  ;;  %v121_v46 = vperm.slane %v116_v41, 1  ;;  %v171_v0 = vadd.f32 %v170_v63, %v169_v62 }
  0x20   :  { %v122_v47 = vperm.slane %v117_v44, 0  ;;  %v123_v48 = vperm.slane %v117_v44, 1 }
  0x21   :  { %v147_v50 = vsel %vm146_vm2, %v120_v45, 0.0  ;;  %v148_v51 = vsel %vm146_vm2, %v121_v46, 0.0 }
  0x22   :  { %v149_v54 = vadd.f32 %v148_v51, %v147_v50  ;;  %v150_v55 = vsel %vm146_vm2, %v122_v47, 0.0  ;;  %v152_v56 = vsel %vm146_vm2, %v123_v48, 0.0 }
  0x24   :  { %v151_v57 = vadd.f32 %v150_v55, %v149_v54 }
  0x26   :  { %v153_v61 = vadd.f32 %v152_v56, %v151_v57 }
  0x28   :  { %154 = vadd.xlane.f32.xlu0 %v153_v61 }
  0x30   :  { %172 = vadd.xlane.f32.xlu0 %v171_v0 }
  0x9b   :  { %v155_v1 = vpop.xlane.xlu0 %154 }
  0x9c   :  { %v156_v2 = vrot.slane %v155_v1, 4 }
  0x9e   :  { %v157_v3 = vadd.f32 %v156_v2, %v155_v1 }
  0xa0   :  { %v158_v4 = vrot.slane %v157_v3, 2 }
  0xa2   :  { %v159_v5 = vadd.f32 %v158_v4, %v157_v3 }
  0xa3   :  { %v173_v6 = vpop.xlane.xlu0 %172 }
  0xa4   :  { %v174_v7 = vrot.slane %v173_v6, 4  ;;  %v160_v8 = vrot.slane %v159_v5, 1 }
  0xa6   :  { %v175_v9 = vadd.f32 %v174_v7, %v173_v6  ;;  %v161_v10 = vadd.f32 %v160_v8, %v159_v5 }
  0xa8   :  { %v176_v11 = vrot.slane %v175_v9, 2  ;;  %219 = vpush %v161_v10 }
  0xaa   :  { %v177_v12 = vadd.f32 %v176_v11, %v175_v9 }
  0xac   :  { %v178_v13 = vrot.slane %v177_v12, 1 }
  0xae   :  { %v179_v14 = vadd.f32 %v178_v13, %v177_v12 }
  0xb0   :  { %221 = vpush %v179_v14 }
  0xd9   :  { %s220_s27 = spop %219 }
  0xda   :  { %v163_v15 = vstv %s220_s27 }
  0xdb   :  { %164 = vst [vmem:[#allocation7] sm:$0xff] %v163_v15 }
  0xdc   :  { %193 = dma.vmem_to_hbm [thread:$0]  %s189_s1, 128, %s191_s26, [#allocation4]  }
  0xe1   :  { %s222_s6 = spop %221 }
  0xe2   :  { %v181_v16 = vstv %s222_s6 }
  0xe3   :  { %182 = vst [vmem:[#allocation8] sm:$0xff] %v181_v16 }
  0xe4   :  { %204 = dma.vmem_to_hbm [thread:$0]  %s200_s29, 128, %s202_s5, [#allocation9]  }
  0xe5   :  { %330 = dma.done.wait [#allocation4], 128  }
  0xe6   :  { %331 = vsyncadd [#allocation4], 4294967168 }
  0xe7   :  { %332 = dma.done.wait [#allocation9], 128  }
  0xe8   :  { %333 = vsyncadd [#allocation9], 4294967168 }
  0xe9   :  { %213 = vsyncpa [#allocation3], 1 }
  0xea   :  { %214 = vsyncpa [#allocation6], 1 }
  0xeb   :  { %215 = vsyncpa [#allocation4], 1 }
  0xec   :  { %216 = vsyncpa [#allocation9], 1 }

</bundles_post_ra>
